<compile_context>
chip_gen: v7x
topology: tpu7x:2x2x1
jax: 0.10.0
libtpu: 0.0.40
codegen_flags: <defaults>
</compile_context>

<pallas_src>
import functools
import math

import jax
import jax.numpy as jnp
from jax.experimental import pallas as pl
from jax.experimental.pallas import tpu as pltpu

BN_EPS = 1e-5   # torch.nn.BatchNorm1d default eps
LANE = 128      # TPU lane width


def _round_up(n, m):
    return ((n + m - 1) // m) * m


def _fused_mlp_kernel(*refs, num_layers):
    """Fused MLP on one batch tile: (Linear(+folded BN) -> ReLU) x num_layers.

    refs = (x_ref, w0_ref, b0_ref, w1_ref, b1_ref, ..., o_ref)
    Weights are pre-folded with eval-mode BN, zero-padded to 128-lane output
    widths and stored in bf16; biases are f32.
    """
    x_ref = refs[0]
    o_ref = refs[-1]
    wb = refs[1:-1]

    h = x_ref[...].astype(jnp.float32)               # (TB, in_dim)
    for l in range(num_layers):                      # unrolled Python loop
        w = wb[2 * l][...]                           # bf16 (d_in[_pad], d_out_pad)
        b = wb[2 * l + 1][...]                       # f32  (1, d_out_pad)
        # bf16 x bf16 operands, f32 MXU accumulation.
        h = jnp.dot(h.astype(jnp.bfloat16), w,
                    preferred_element_type=jnp.float32) + b
        h = jnp.maximum(h, 0.0)                      # ReLU (f32)
    o_ref[...] = h.astype(o_ref.dtype)


def prepare_mlp_params(params, *, batch_norm):
    """One-time (model-load) prep: fold eval-mode BN into (W, b) exactly in f32,
    zero-pad output lanes to multiples of 128, cast W -> bf16.

    Returns (weights, biases, out_dim) where weights/biases are tuples of
    padded arrays ready to be fed to the kernel.
    """
    weights, biases = [], []
    prev_pad = None
    for li, (w, b, gamma, beta, rm, rv) in enumerate(params):
        w = w.astype(jnp.float32)
        b = b.astype(jnp.float32)
        if batch_norm:
            scale = gamma * jax.lax.rsqrt(rv + BN_EPS)        # (out,)
            w = w * scale[None, :]                            # per-output column
            b = (b - rm) * scale + beta
        d_in, d_out = w.shape
        # First layer keeps the true in_dim (x is fed unpadded); deeper layers
        # match the 128-padded width of the previous layer's output.
        d_in_pad = d_in if li == 0 else prev_pad
        d_out_pad = _round_up(d_out, LANE)
        w_p = jnp.zeros((d_in_pad, d_out_pad), jnp.float32).at[:d_in, :d_out].set(w)
        b_p = jnp.zeros((1, d_out_pad), jnp.float32).at[0, :d_out].set(b)
        weights.append(w_p.astype(jnp.bfloat16))
        biases.append(b_p)
        prev_pad = d_out_pad
    out_dim = params[-1][0].shape[1]
    return tuple(weights), tuple(biases), out_dim


def _pick_batch_tile(B):
    """bf16 activations -> keep a multiple of 16 (sublane packing).
    Small B: one fat grid step.  Large B: 256-row tiles (fills v6e/v7x MXU M
    dimension) and >= 2 grid steps so both v7x TensorCores get work."""
    if B <= 256:
        return _round_up(B, 16)
    return 256


@functools.partial(jax.jit, static_argnames=("out_dim", "batch_tile"))
def mlp_layer_forward(x, weights, biases, *, out_dim, batch_tile=None):
    """MlpLayer.forward as one fused pallas_call (inference semantics)."""
    B, in_dim = x.shape
    num_layers = len(weights)
    assert num_layers >= 1
    if batch_tile is None:
        batch_tile = _pick_batch_tile(B)
    assert batch_tile % 16 == 0, "batch_tile must be a multiple of 16 (bf16 sublanes)"
    out_pad = weights[-1].shape[1]
    grid = (pl.cdiv(B, batch_tile),)      # ragged last tile handled by Pallas

    # x block: last dim == full in_dim (exempt from 128 rule) -> no x padding
    # is ever materialized in HBM.
    in_specs = [pl.BlockSpec((batch_tile, in_dim), lambda i: (i, 0))]
    flat_inputs = [x.astype(jnp.float32)]
    for w_p, b_p in zip(weights, biases):
        # Grid-invariant params: single-buffered, resident in VMEM for the
        # whole batch grid.
        in_specs.append(pl.BlockSpec(w_p.shape, lambda i: (0, 0),
                                     pipeline_mode=pl.Buffered(1)))
        in_specs.append(pl.BlockSpec(b_p.shape, lambda i: (0, 0),
                                     pipeline_mode=pl.Buffered(1)))
        flat_inputs.extend([w_p, b_p])

    # VMEM budget: single-buffered params + double-buffered x/out tiles (+ slack).
    # Raise the scoped limit only when needed (v5e default is 16 MiB, v6e/v7x 32 MiB);
    # v7x physical VMEM is 64 MiB so very large weight sets would instead need a
    # streaming K/N grid axis.
    param_bytes = sum(int(a.size) * a.dtype.itemsize
                      for a in (list(weights) + list(biases)))
    act_bytes = 2 * batch_tile * (in_dim + out_pad) * 4
    need = param_bytes + act_bytes + (4 << 20)
    vmem_limit = int(min(need, 100 << 20)) if need > (16 << 20) else None

    kernel = functools.partial(_fused_mlp_kernel, num_layers=num_layers)
    out = pl.pallas_call(
        kernel,
        out_shape=jax.ShapeDtypeStruct((B, out_pad), x.dtype),
        grid_spec=pltpu.PrefetchScalarGridSpec(
            num_scalar_prefetch=0,
            grid=grid,
            in_specs=in_specs,
            out_specs=pl.BlockSpec((batch_tile, out_pad), lambda i: (i, 0)),
        ),
        compiler_params=pltpu.CompilerParams(
            dimension_semantics=("parallel",),
            vmem_limit_bytes=vmem_limit),
    )(*flat_inputs)

    return out[:, :out_dim]    # drop zero-padded output lanes


def init_mlp_params(key, input_dim, hidden_units):
    """Matches MlpUnitLayer._init_weight_: xavier_normal_ weight, zero bias,
       BatchNorm1d at default init (gamma=1, beta=0, running stats 0/1)."""
    params = []
    dims = [input_dim] + list(hidden_units)
    for i in range(len(hidden_units)):
        fan_in, fan_out = dims[i], dims[i + 1]
        key, wkey = jax.random.split(key)
        std = math.sqrt(2.0 / (fan_in + fan_out))  # xavier normal, gain=1
        # torch stores weight as (out, in); we store its transpose (in, out)
        # so the kernel computes x @ W == x @ weight.T.
        w = (std * jax.random.normal(wkey, (fan_in, fan_out))).astype(jnp.float32)
        b = jnp.zeros((fan_out,), jnp.float32)
        gamma = jnp.ones((fan_out,), jnp.float32)
        beta = jnp.zeros((fan_out,), jnp.float32)
        running_mean = jnp.zeros((fan_out,), jnp.float32)
        running_var = jnp.ones((fan_out,), jnp.float32)
        params.append((w, b, gamma, beta, running_mean, running_var))
    return params


def mlp_layer_reference(x, params, *, batch_norm):
    """Pure-JAX f32 reference (unfolded BN)."""
    for (w, b, gamma, beta, rm, rv) in params:
        y = x @ w + b
        if batch_norm:
            y = (y - rm) * jax.lax.rsqrt(rv + BN_EPS) * gamma + beta
        x = jnp.maximum(y, 0.0)
    return x


def mlp_reference_bf16(x, weights, biases):
    """Pure-JAX reference matched to the kernel's bf16-operand / f32-accumulate math."""
    h = x.astype(jnp.float32)
    for w, b in zip(weights, biases):
        h = jnp.dot(h.astype(jnp.bfloat16), w,
                    preferred_element_type=jnp.float32) + b
        h = jnp.maximum(h, 0.0)
    return h


if __name__ == "__main__":
    # Module config: MlpLayer(input_dim=32, hidden_units=[64, 48, 32],
    #                         batch_norm=True, dropout_rates=0.0)
    input_dim = 32
    hidden_units = [64, 48, 32]
    batch_norm = True
    batch = 16   # small demo batch -> one 16-row grid step

    key = jax.random.PRNGKey(0)
    key, xkey = jax.random.split(key)
    x = jax.random.normal(xkey, (batch, input_dim), dtype=jnp.float32)

    params = init_mlp_params(key, input_dim, hidden_units)

    # One-time (model-load) prep: fold BN, pad lanes to 128, cast W -> bf16.
    weights, biases, out_dim = prepare_mlp_params(params, batch_norm=batch_norm)

    out = mlp_layer_forward(x, weights, biases, out_dim=out_dim)
    out = jax.block_until_ready(out)
    assert out.shape == (batch, hidden_units[-1]), out.shape

    # bf16-matched reference: tight tolerance.
    ref_bf16 = mlp_reference_bf16(x, weights, biases)[:, :out_dim]
    assert jnp.allclose(out, ref_bf16, atol=1e-2, rtol=1e-2), \
        "mismatch vs bf16-matched reference"

    # f32 reference (unfolded BN): loose tolerance because of bf16 matmul operands.
    ref_f32 = mlp_layer_reference(x, params, batch_norm=batch_norm)
    assert jnp.allclose(out, ref_f32, atol=5e-2, rtol=5e-2), \
        "mismatch vs f32 reference"

    print("KERNEL_OK")
</pallas_src>

<mosaic_0001>
module attributes {stable_mosaic.version = 11 : i64} {
  func.func @_fused_mlp_kernel(%arg0: i32, %arg1: memref<16x32xf32, #tpu.memory_space<vmem>>, %arg2: memref<32x128xbf16, #tpu.memory_space<vmem>>, %arg3: memref<1x128xf32, #tpu.memory_space<vmem>>, %arg4: memref<128x128xbf16, #tpu.memory_space<vmem>>, %arg5: memref<1x128xf32, #tpu.memory_space<vmem>>, %arg6: memref<128x128xbf16, #tpu.memory_space<vmem>>, %arg7: memref<1x128xf32, #tpu.memory_space<vmem>>, %arg8: memref<16x128xf32, #tpu.memory_space<vmem>>) attributes {dimension_semantics = [#tpu.dimension_semantics<parallel>], iteration_bounds = array<i64: 1>, scalar_prefetch = 0 : i64, scratch_operands = 0 : i64, tpu.core_type = #tpu.core_type<tc>, window_params = [{transform_indices = @transform_0, window_bounds = array<i64: 16, 32>}, {pipeline_mode = #tpu.pipeline_mode<synchronous>, transform_indices = @transform_1, window_bounds = array<i64: 32, 128>}, {pipeline_mode = #tpu.pipeline_mode<synchronous>, transform_indices = @transform_2, window_bounds = array<i64: 1, 128>}, {pipeline_mode = #tpu.pipeline_mode<synchronous>, transform_indices = @transform_3, window_bounds = array<i64: 128, 128>}, {pipeline_mode = #tpu.pipeline_mode<synchronous>, transform_indices = @transform_4, window_bounds = array<i64: 1, 128>}, {pipeline_mode = #tpu.pipeline_mode<synchronous>, transform_indices = @transform_5, window_bounds = array<i64: 128, 128>}, {pipeline_mode = #tpu.pipeline_mode<synchronous>, transform_indices = @transform_6, window_bounds = array<i64: 1, 128>}, {transform_indices = @transform_7, window_bounds = array<i64: 16, 128>}]} {
    %c0 = arith.constant 0 : index
    %c0_0 = arith.constant 0 : index
    %0 = vector.load %arg1[%c0, %c0_0] : memref<16x32xf32, #tpu.memory_space<vmem>>, vector<16x32xf32>
    %c0_1 = arith.constant 0 : index
    %c0_2 = arith.constant 0 : index
    %1 = vector.load %arg2[%c0_1, %c0_2] : memref<32x128xbf16, #tpu.memory_space<vmem>>, vector<32x128xbf16>
    %c0_3 = arith.constant 0 : index
    %c0_4 = arith.constant 0 : index
    %2 = vector.load %arg3[%c0_3, %c0_4] : memref<1x128xf32, #tpu.memory_space<vmem>>, vector<1x128xf32>
    %3 = arith.truncf %0 : vector<16x32xf32> to vector<16x32xbf16>
    %cst = arith.constant dense<0.000000e+00> : vector<16x128xf32>
    %4 = tpu.matmul %3, %1, %cst {dimension_numbers = #tpu.dot_dimension_numbers<[1], [0], [0], [1], [0, 0, 1, 1], [], []>} : vector<16x32xbf16>, vector<32x128xbf16>, vector<16x128xf32> -> vector<16x128xf32>
    %5 = vector.broadcast %2 : vector<1x128xf32> to vector<16x128xf32>
    %6 = arith.addf %4, %5 : vector<16x128xf32>
    %cst_5 = arith.constant 0.000000e+00 : f32
    %7 = vector.broadcast %cst_5 : f32 to vector<16x128xf32>
    %8 = arith.maximumf %6, %7 : vector<16x128xf32>
    %c0_6 = arith.constant 0 : index
    %c0_7 = arith.constant 0 : index
    %9 = vector.load %arg4[%c0_6, %c0_7] : memref<128x128xbf16, #tpu.memory_space<vmem>>, vector<128x128xbf16>
    %c0_8 = arith.constant 0 : index
    %c0_9 = arith.constant 0 : index
    %10 = vector.load %arg5[%c0_8, %c0_9] : memref<1x128xf32, #tpu.memory_space<vmem>>, vector<1x128xf32>
    %11 = arith.truncf %8 : vector<16x128xf32> to vector<16x128xbf16>
    %cst_10 = arith.constant dense<0.000000e+00> : vector<16x128xf32>
    %12 = tpu.matmul %11, %9, %cst_10 {dimension_numbers = #tpu.dot_dimension_numbers<[1], [0], [0], [1], [0, 0, 1, 1], [], []>} : vector<16x128xbf16>, vector<128x128xbf16>, vector<16x128xf32> -> vector<16x128xf32>
    %13 = vector.broadcast %10 : vector<1x128xf32> to vector<16x128xf32>
    %14 = arith.addf %12, %13 : vector<16x128xf32>
    %cst_11 = arith.constant 0.000000e+00 : f32
    %15 = vector.broadcast %cst_11 : f32 to vector<16x128xf32>
    %16 = arith.maximumf %14, %15 : vector<16x128xf32>
    %c0_12 = arith.constant 0 : index
    %c0_13 = arith.constant 0 : index
    %17 = vector.load %arg6[%c0_12, %c0_13] : memref<128x128xbf16, #tpu.memory_space<vmem>>, vector<128x128xbf16>
    %c0_14 = arith.constant 0 : index
    %c0_15 = arith.constant 0 : index
    %18 = vector.load %arg7[%c0_14, %c0_15] : memref<1x128xf32, #tpu.memory_space<vmem>>, vector<1x128xf32>
    %19 = arith.truncf %16 : vector<16x128xf32> to vector<16x128xbf16>
    %cst_16 = arith.constant dense<0.000000e+00> : vector<16x128xf32>
    %20 = tpu.matmul %19, %17, %cst_16 {dimension_numbers = #tpu.dot_dimension_numbers<[1], [0], [0], [1], [0, 0, 1, 1], [], []>} : vector<16x128xbf16>, vector<128x128xbf16>, vector<16x128xf32> -> vector<16x128xf32>
    %21 = vector.broadcast %18 : vector<1x128xf32> to vector<16x128xf32>
    %22 = arith.addf %20, %21 : vector<16x128xf32>
    %cst_17 = arith.constant 0.000000e+00 : f32
    %23 = vector.broadcast %cst_17 : f32 to vector<16x128xf32>
    %24 = arith.maximumf %22, %23 : vector<16x128xf32>
    %c0_18 = arith.constant 0 : index
    %c0_19 = arith.constant 0 : index
    %25 = vector.load %arg8[%c0_18, %c0_19] : memref<16x128xf32, #tpu.memory_space<vmem>>, vector<16x128xf32>
    tpu.vector_store %arg8[%c0_18, %c0_19], %24 {strides = array<i32>} : memref<16x128xf32, #tpu.memory_space<vmem>>, vector<16x128xf32>,
    return
  }
  func.func @transform_0(%arg0: i32) -> (i32, i32) {
    %c0_i32 = arith.constant 0 : i32
    %c0_i32_0 = arith.constant 0 : i32
    return %arg0, %c0_i32 : i32, i32
  }
  func.func @transform_1(%arg0: i32) -> (i32, i32) {
    %c0_i32 = arith.constant 0 : i32
    %c0_i32_0 = arith.constant 0 : i32
    %c0_i32_1 = arith.constant 0 : i32
    return %c0_i32, %c0_i32_0 : i32, i32
  }
  func.func @transform_2(%arg0: i32) -> (i32, i32) {
    %c0_i32 = arith.constant 0 : i32
    %c0_i32_0 = arith.constant 0 : i32
    %c0_i32_1 = arith.constant 0 : i32
    return %c0_i32, %c0_i32_0 : i32, i32
  }
  func.func @transform_3(%arg0: i32) -> (i32, i32) {
    %c0_i32 = arith.constant 0 : i32
    %c0_i32_0 = arith.constant 0 : i32
    %c0_i32_1 = arith.constant 0 : i32
    return %c0_i32, %c0_i32_0 : i32, i32
  }
  func.func @transform_4(%arg0: i32) -> (i32, i32) {
    %c0_i32 = arith.constant 0 : i32
    %c0_i32_0 = arith.constant 0 : i32
    %c0_i32_1 = arith.constant 0 : i32
    return %c0_i32, %c0_i32_0 : i32, i32
  }
  func.func @transform_5(%arg0: i32) -> (i32, i32) {
    %c0_i32 = arith.constant 0 : i32
    %c0_i32_0 = arith.constant 0 : i32
    %c0_i32_1 = arith.constant 0 : i32
    return %c0_i32, %c0_i32_0 : i32, i32
  }
  func.func @transform_6(%arg0: i32) -> (i32, i32) {
    %c0_i32 = arith.constant 0 : i32
    %c0_i32_0 = arith.constant 0 : i32
    %c0_i32_1 = arith.constant 0 : i32
    return %c0_i32, %c0_i32_0 : i32, i32
  }
  func.func @transform_7(%arg0: i32) -> (i32, i32) {
    %c0_i32 = arith.constant 0 : i32
    %c0_i32_0 = arith.constant 0 : i32
    return %arg0, %c0_i32 : i32, i32
  }
}

</mosaic_0001>

<bundles_post_ra>
// kernel: mlp_layer_forward.1
= control target key start
LH: loop header
LB: loop body
LE: loop exit
PB: predicated region body
PF: predicated region fallthrough
CT: control target
= control target key end

     0   :  { %12 = vsyncpa [#allocation3], 0  ;;  %s811_s0 = inlined_call_operand.hbm [shape: f32[16,32], index: 0, kind: input, shape index: {}]   ;;  %s812_s1 = inlined_call_operand.hbm [shape: bf16[32,128], index: 1, kind: input, shape index: {}]   ;;  %s813_s2 = inlined_call_operand.vmem [shape: f32[1,128], index: 2, kind: input, shape index: {}]   ;;  %s814_s3 = inlined_call_operand.hbm [shape: bf16[128,128], index: 3, kind: input, shape index: {}]   ;;  %s815_s4 = inlined_call_operand.vmem [shape: f32[1,128], index: 4, kind: input, shape index: {}]   ;;  %s816_s5 = inlined_call_operand.hbm [shape: bf16[128,128], index: 5, kind: input, shape index: {}]   ;;  %s817_s6 = inlined_call_operand.vmem [shape: f32[1,128], index: 6, kind: input, shape index: {}]   ;;  %s818_s7 = inlined_call_operand.hbm [shape: f32[16,128], index: 7, kind: output, shape index: {}]  }
   0x1   :  { %13 = vsyncpa [#allocation6], 0 }
   0x2   :  { %14 = vsyncpa [#allocation9], 0 }
   0x3   :  { %15 = vsyncpa [#allocation4], 0  ;;  %s645_s24 = smov [#allocation5]   ;;  %s527_s28 = scalar_lea.hbm %s812_s1, 256 }
   0x4   :  { %s33_s25 = sshll.u32 %s645_s24, 4  ;;  %p528_p0 = scmp.ne.s32.totalorder %s812_s1, %s527_s28  ;;  %s34_s25 = int_to_ptr.vmem [resolvable:$true] %s33_s25 }
   0x5   :  { %p531_p1 = scmp.lt.u32.totalorder %s527_s28, %s812_s1 }
   0x7   :  { %p533_p2 = pnand %p531_p1, %p528_p0 }
   0x9   :  { %536 = shalt.err (!%p533_p2)
}
   0xa   :  { %s537_s10 = scalar_lea.vmem %s34_s25, 256  ;;  %p542_p4 = scmp.lt.s32.totalorder %s34_s25, %s34_s25 }
   0xb   :  { %p538_p3 = scmp.ne.s32.totalorder %s34_s25, %s537_s10  ;;  %p543_p5 = scmp.lt.s32.totalorder %s537_s10, %s537_s10 }
   0xd   :  { %p544_p6 = por %p543_p5, %p542_p4 }
   0xf   :  { %p545_p7 = pnand %p544_p6, %p538_p3 }
  0x11   :  { %548 = shalt.err (!%p545_p7)
}
  0x12   :  { %s646_s11 = smov 64   ;;  %s647_s12 = smov 4  }
  0x13   :  { %39 = dma.hbm_to_vmem [thread:$0]  %s812_s1, 256, %s34_s25, [#allocation6], %s646_s11, %s646_s11, %s647_s12  }
  0x14   :  { %s648_s15 = smov [#allocation2]   ;;  %s549_s19 = scalar_lea.hbm %s811_s0, 256 }
  0x15   :  { %s21_s16 = sshll.u32 %s648_s15, 4  ;;  %p550_p8 = scmp.ne.s32.totalorder %s811_s0, %s549_s19  ;;  %s22_s16 = int_to_ptr.vmem [resolvable:$true] %s21_s16 }
  0x16   :  { %p553_p9 = scmp.lt.u32.totalorder %s549_s19, %s811_s0 }
  0x18   :  { %p555_p10 = pnand %p553_p9, %p550_p8 }
  0x1a   :  { %558 = shalt.err (!%p555_p10)
}
  0x1b   :  { %s559_s24 = scalar_lea.vmem %s22_s16, 256  ;;  %p564_p12 = scmp.lt.s32.totalorder %s22_s16, %s22_s16 }
  0x1c   :  { %p560_p11 = scmp.ne.s32.totalorder %s22_s16, %s559_s24  ;;  %p565_p13 = scmp.lt.s32.totalorder %s559_s24, %s559_s24 }
  0x1e   :  { %p566_p0 = por %p565_p13, %p564_p12 }
  0x20   :  { %p567_p1 = pnand %p566_p0, %p560_p11 }
  0x22   :  { %570 = shalt.err (!%p567_p1)
}
  0x23   :  { %s649_s1 = smov 128   ;;  %s650_s25 = smov 8  }
  0x24   :  { %27 = dma.hbm_to_vmem [thread:$0]  %s811_s0, 256, %s22_s16, [#allocation3], %s649_s1, %s649_s1, %s650_s25  }
  0x25   :  { %s651_s28 = smov [#allocation7]   ;;  %s652_s30 = smov [#allocation8]  }
  0x26   :  { %s47_s29 = sshll.u32 %s651_s28, 4  ;;  %s61_s8 = sshll.u32 %s652_s30, 4  ;;  %s48_s29 = int_to_ptr.vmem [resolvable:$true] %s47_s29  ;;  %s726_s8 = int_to_ptr.vmem [resolvable:$true] %s61_s8 }
  0x27   :  { %s571_s13 = scalar_lea.hbm %s814_s3, 1024 }
  0x28   :  { %p572_p2 = scmp.ne.s32.totalorder %s814_s3, %s571_s13  ;;  %p575_p3 = scmp.lt.u32.totalorder %s571_s13, %s814_s3 }
  0x2a   :  { %p577_p4 = pnand %p575_p3, %p572_p2 }
  0x2c   :  { %580 = shalt.err (!%p577_p4)
}
  0x2d   :  { %s581_s0 = scalar_lea.vmem %s48_s29, 1024  ;;  %p586_p6 = scmp.lt.s32.totalorder %s48_s29, %s48_s29 }
  0x2e   :  { %p582_p5 = scmp.ne.s32.totalorder %s48_s29, %s581_s0  ;;  %p587_p7 = scmp.lt.s32.totalorder %s581_s0, %s581_s0 }
  0x30   :  { %p588_p8 = por %p587_p7, %p586_p6 }
  0x32   :  { %p589_p9 = pnand %p588_p8, %p582_p5 }
  0x34   :  { %592 = shalt.err (!%p589_p9)
}
  0x35   :  { %53 = dma.hbm_to_vmem [thread:$0]  %s814_s3, 1024, %s48_s29, [#allocation6], %s646_s11, %s646_s11, %s647_s12  }
  0x36   :  { %s593_s22 = scalar_lea.hbm %s816_s5, 1024 }
  0x37   :  { %p594_p10 = scmp.ne.s32.totalorder %s816_s5, %s593_s22  ;;  %p597_p11 = scmp.lt.u32.totalorder %s593_s22, %s816_s5 }
  0x39   :  { %p599_p12 = pnand %p597_p11, %p594_p10 }
  0x3b   :  { %602 = shalt.err (!%p599_p12)
}
  0x3c   :  { %s603_s28 = scalar_lea.vmem %s726_s8, 1024  ;;  %p608_p0 = scmp.lt.s32.totalorder %s726_s8, %s726_s8 }
  0x3d   :  { %p604_p13 = scmp.ne.s32.totalorder %s726_s8, %s603_s28  ;;  %p609_p1 = scmp.lt.s32.totalorder %s603_s28, %s603_s28 }
  0x3f   :  { %p610_p2 = por %p609_p1, %p608_p0 }
  0x41   :  { %p611_p3 = pnand %p610_p2, %p604_p13 }
  0x43   :  { %614 = shalt.err (!%p611_p3)
}
  0x44   :  { %67 = dma.hbm_to_vmem [thread:$0]  %s816_s5, 1024, %s726_s8, [#allocation9], %s646_s11, %s646_s11, %s647_s12  }
  0x45   :  { %637 = dma.done.wait [#allocation3], 256  }
  0x46   :  { %638 = vsyncadd [#allocation3], 4294967040 }
  0x47   :  { %639 = dma.done.wait [#allocation6], 1280  }
  0x48   :  { %640 = vsyncadd [#allocation6], 4294966016 }
  0x49   :  { %641 = dma.done.wait [#allocation9], 1024  }
  0x4a   :  { %642 = vsyncadd [#allocation9], 4294966272  ;;  %v653_v0 = vmov 0.0   ;;  %vm654_vm0 = vmmov 0   ;;  %v509_v1 = vld [vmem:[#allocation5] sm:$0xff]   ;;  %v510_v2 = vld [vmem:[#allocation5 + $0x8] sm:$0xff]  }
  0x4b   :  { %450 = vmatprep.subr.bf16.mxu0 %v653_v0  ;;  %454 = vmatprep.mubr.msk.bf16.mxu0 %vm654_vm0, %v653_v0  ;;  %v83_v3 = vld [vmem:[#allocation2] sm:$0xff]  ;;  %v84_v4 = vld [vmem:[#allocation2 + $0x8] sm:$0xff]  ;;  %vm109_vm1 = vcmask 261120   ;;  %v513_v8 = vld [vmem:[#allocation7 + $0x10] sm:$0xff]   ;;  %s655_s9 = smov [#allocation10]  }
  0x4c   :  { %458 = vmatprep.subr.bf16.mxu1 %v653_v0  ;;  %474 = vmatprep.mubr.msk.bf16.mxu1 %vm654_vm0, %v653_v0  ;;  %v511_v5 = vld [vmem:[#allocation7] sm:$0xff]   ;;  %v90_v6 = vpack.c.bf16 %v84_v4, %v83_v3  ;;  %v512_v7 = vld [vmem:[#allocation7 + $0x8] sm:$0xff]   ;;  %v514_v9 = vld [vmem:[#allocation7 + $0x18] sm:$0xff]  }
  0x4d   :  { %451 = vmatpush3.bf16.msra.mxu0 %v509_v1  ;;  %459 = vmatpush3.bf16.msra.mxu1 %v511_v5  ;;  %v515_v10 = vld [vmem:[#allocation7 + $0x20] sm:$0xff]   ;;  %v516_v11 = vld [vmem:[#allocation7 + $0x28] sm:$0xff]   ;;  %v517_v12 = vld [vmem:[#allocation7 + $0x30] sm:$0xff]  }
  0x4e   :  { %452 = vmatprep.subr.bf16.mxu0 %v653_v0  ;;  %460 = vmatprep.subr.bf16.mxu1 %v653_v0  ;;  %v518_v13 = vld [vmem:[#allocation7 + $0x38] sm:$0xff]   ;;  %v519_v14 = vld [vmem:[#allocation8] sm:$0xff]   ;;  %v520_v15 = vld [vmem:[#allocation8 + $0x8] sm:$0xff]  }
  0x4f   :  { %v521_v16 = vld [vmem:[#allocation8 + $0x10] sm:$0xff]   ;;  %v522_v17 = vld [vmem:[#allocation8 + $0x18] sm:$0xff]   ;;  %v523_v18 = vld [vmem:[#allocation8 + $0x20] sm:$0xff]  }
  0x50   :  { %v524_v19 = vld [vmem:[#allocation8 + $0x28] sm:$0xff]   ;;  %v407_v20 = vld [vmem:[%s813_s2] ss:$0 sm:$0xff]  ;;  %v525_v30 = vld [vmem:[#allocation8 + $0x30] sm:$0xff]  }
  0x51   :  { %453 = vmatpush3.bf16.msra.mxu0 %v510_v2  ;;  %461 = vmatpush3.bf16.msra.mxu1 %v512_v7  ;;  %v526_v31 = vld [vmem:[#allocation8 + $0x38] sm:$0xff]   ;;  %v411_v32 = vld [vmem:[%s815_s4] ss:$0 sm:$0xff]  ;;  %s393_s4 = sshll.u32 %s655_s9, 4  ;;  %s394_s4 = int_to_ptr.vmem [resolvable:$true] %s393_s4 }
  0x52   :  { %478 = vmatprep.subr.bf16.mxu0 %v653_v0  ;;  %462 = vmatprep.subr.bf16.mxu1 %v653_v0  ;;  %v420_v42 = vld [vmem:[%s817_s6] ss:$0 sm:$0xff]  ;;  %s615_s10 = scalar_lea.vmem %s394_s4, 256  ;;  %p620_p5 = scmp.lt.s32.totalorder %s394_s4, %s394_s4 }
  0x53   :  { %p616_p4 = scmp.ne.s32.totalorder %s394_s4, %s615_s10  ;;  %p621_p6 = scmp.lt.s32.totalorder %s615_s10, %s615_s10 }
  0x54   :  { %455 = vmatmul.mubr.msk.bf16.vlgmr.msra.gmra.mrb[0].mxu0 %vm109_vm1, %v90_v6 }
  0x55   :  { %494 = vmatprep.mubr.msk.bf16.mxu0 %vm654_vm0, %v653_v0  ;;  %463 = vmatpush3.bf16.msra.mxu1 %v513_v8  ;;  %p622_p7 = por %p621_p6, %p620_p5 }
  0x56   :  { %464 = vmatprep.subr.bf16.mxu1 %v653_v0  ;;  %479 = vmatpush3.bf16.msra.mxu0 %v519_v14 }
  0x57   :  { %480 = vmatprep.subr.bf16.mxu0 %v653_v0  ;;  %p623_p8 = pnand %p622_p7, %p616_p4 }
  0x59   :  { %465 = vmatpush3.bf16.msra.mxu1 %v514_v9 }
  0x5a   :  { %466 = vmatprep.subr.bf16.mxu1 %v653_v0  ;;  %481 = vmatpush3.bf16.msra.mxu0 %v520_v15 }
  0x5b   :  { %482 = vmatprep.subr.bf16.mxu0 %v653_v0 }
  0x5d   :  { %467 = vmatpush3.bf16.msra.mxu1 %v515_v10 }
  0x5e   :  { %468 = vmatprep.subr.bf16.mxu1 %v653_v0  ;;  %483 = vmatpush3.bf16.msra.mxu0 %v521_v16 }
  0x5f   :  { %484 = vmatprep.subr.bf16.mxu0 %v653_v0 }
  0x61   :  { %469 = vmatpush3.bf16.msra.mxu1 %v516_v11 }
  0x62   :  { %470 = vmatprep.subr.bf16.mxu1 %v653_v0  ;;  %485 = vmatpush3.bf16.msra.mxu0 %v522_v17 }
  0x63   :  { %486 = vmatprep.subr.bf16.mxu0 %v653_v0 }
  0x65   :  { %471 = vmatpush3.bf16.msra.mxu1 %v517_v12 }
  0x66   :  { %472 = vmatprep.subr.bf16.mxu1 %v653_v0  ;;  %487 = vmatpush3.bf16.msra.mxu0 %v523_v18 }
  0x67   :  { %488 = vmatprep.subr.bf16.mxu0 %v653_v0 }
  0x69   :  { %473 = vmatpush3.bf16.msra.mxu1 %v518_v13 }
  0x6a   :  { %489 = vmatpush3.bf16.msra.mxu0 %v524_v19 }
  0x6b   :  { %490 = vmatprep.subr.bf16.mxu0 %v653_v0 }
  0x6e   :  { %491 = vmatpush3.bf16.msra.mxu0 %v525_v30 }
  0x6f   :  { %492 = vmatprep.subr.bf16.mxu0 %v653_v0 }
  0x72   :  { %493 = vmatpush3.bf16.msra.mxu0 %v526_v31 }
 0x127   :  { %v147_v21 = vpop.f32.mrb[0].mxu0 }
 0x128   :  { %v148_v22 = vadd.f32 %v407_v20, %v147_v21  ;;  %v456_v23 = vpop.f32.mrb[1].mxu0 }
 0x129   :  { %v150_v24 = vpop.f32.mrb[2].mxu0 }
 0x12a   :  { %v151_v25 = vadd.f32 %v407_v20, %v150_v24  ;;  %v457_v26 = vpop.f32.mrb[3].mxu0  ;;  %v154_v27 = vmax.f32 %v148_v22, 0.0 }
 0x12c   :  { %v155_v28 = vmax.f32 %v151_v25, 0.0 }
 0x12e   :  { %v173_v29 = vpack.c.bf16 %v155_v28, %v154_v27 }
 0x130   :  { %475 = vmatmul.mubr.bf16.vlgmr.msra.gmra.mrb[0].mxu1 %v173_v29 }
 0x203   :  { %v262_v33 = vpop.f32.mrb[0].mxu1 }
 0x204   :  { %v263_v34 = vadd.f32 %v411_v32, %v262_v33  ;;  %v476_v35 = vpop.f32.mrb[1].mxu1 }
 0x205   :  { %v265_v36 = vpop.f32.mrb[2].mxu1 }
 0x206   :  { %v266_v37 = vadd.f32 %v411_v32, %v265_v36  ;;  %v477_v38 = vpop.f32.mrb[3].mxu1  ;;  %v269_v39 = vmax.f32 %v263_v34, 0.0 }
 0x208   :  { %v270_v40 = vmax.f32 %v266_v37, 0.0 }
 0x20a   :  { %v288_v41 = vpack.c.bf16 %v270_v40, %v269_v39 }
 0x20c   :  { %495 = vmatmul.mubr.bf16.vlgmr.msra.gmra.mrb[4].mxu0 %v288_v41 }
 0x2df   :  { %v377_v43 = vpop.f32.mrb[4].mxu0 }
 0x2e0   :  { %v378_v44 = vadd.f32 %v420_v42, %v377_v43  ;;  %v496_v45 = vpop.f32.mrb[5].mxu0 }
 0x2e1   :  { %v380_v46 = vpop.f32.mrb[6].mxu0 }
 0x2e2   :  { %v384_v47 = vmax.f32 %v378_v44, 0.0  ;;  %v381_v48 = vadd.f32 %v420_v42, %v380_v46  ;;  %v497_v49 = vpop.f32.mrb[7].mxu0 }
 0x2e4   :  { %386 = vst [vmem:[#allocation10] sm:$0xff] %v384_v47  ;;  %v385_v50 = vmax.f32 %v381_v48, 0.0 }
 0x2e6   :  { %387 = vst [vmem:[#allocation10 + $0x8] sm:$0xff] %v385_v50 }
 0x2e7   :  { %626 = shalt.err (!%p623_p8)
}
 0x2e8   :  { %s627_s14 = scalar_lea.hbm %s818_s7, 256 }
 0x2e9   :  { %p628_p9 = scmp.ne.s32.totalorder %s818_s7, %s627_s14  ;;  %p631_p10 = scmp.lt.u32.totalorder %s627_s14, %s818_s7 }
 0x2eb   :  { %p633_p11 = pnand %p631_p10, %p628_p9 }
 0x2ed   :  { %636 = shalt.err (!%p633_p11)
}
 0x2ee   :  { %399 = dma.vmem_to_hbm [thread:$0]  %s394_s4, 256, %s818_s7, [#allocation4], %s649_s1, %s649_s1, %s650_s25  }
 0x2ef   :  { %643 = dma.done.wait [#allocation4], 256  }
 0x2f0   :  { %644 = vsyncadd [#allocation4], 4294967040 }
 0x2f1   :  { %403 = vsyncpa [#allocation3], 1 }
 0x2f2   :  { %404 = vsyncpa [#allocation6], 1 }
 0x2f3   :  { %405 = vsyncpa [#allocation9], 1 }
 0x2f4   :  { %406 = vsyncpa [#allocation4], 1 }

</bundles_post_ra>
